<compile_context>
chip_gen: v7x
topology: tpu7x:2x2x1
jax: 0.10.0
libtpu: 0.0.40
codegen_flags: <defaults>
</compile_context>

<pallas_src>
import functools

import jax
import jax.numpy as jnp
from jax.experimental import pallas as pl
from jax.experimental.pallas import tpu as pltpu


def _round_up(x, m):
    return (x + m - 1) // m * m


# ---------------------------------------------------------------------------
# Kernels
# ---------------------------------------------------------------------------
def _fc_kernel_whole_k(x_ref, w_ref, b_ref, o_ref, *, relu):
    # One (tm, tn) output tile: x(tm, K) @ w(K, tn) + b(1, tn), optional ReLU.
    y = jnp.dot(x_ref[...], w_ref[...], preferred_element_type=jnp.float32)
    y = y + b_ref[...].astype(jnp.float32)
    if relu:
        y = jnp.maximum(y, 0.0)
    o_ref[...] = y.astype(o_ref.dtype)


def _fc_kernel_k_tiled(x_ref, w_ref, b_ref, o_ref, acc_ref, *, relu):
    # Grid = (n, m, k) with k innermost ("arbitrary"); f32 accumulator scratch.
    k = pl.program_id(2)

    @pl.when(k == 0)
    def _():
        acc_ref[...] = jnp.zeros_like(acc_ref)

    acc_ref[...] += jnp.dot(x_ref[...], w_ref[...],
                            preferred_element_type=jnp.float32)

    @pl.when(k == pl.num_programs(2) - 1)
    def _():
        y = acc_ref[...] + b_ref[...].astype(jnp.float32)
        if relu:
            y = jnp.maximum(y, 0.0)
        o_ref[...] = y.astype(o_ref.dtype)


# ---------------------------------------------------------------------------
# Generation-aware configuration
# ---------------------------------------------------------------------------
def _vmem_capacity_bytes():
    try:
        info = pltpu.get_tpu_info()
        cap = getattr(info, "vmem_capacity_bytes", None)
        if cap:
            return int(cap)
    except Exception:
        pass
    return 64 * 1024 * 1024  # conservative (v7x per-TensorCore)


def _choose_tiles(M, K, N, itemsize, out_itemsize, budget, tm_base, tn_base,
                  sub, force_k_split, tk_pref):
    """Returns (tm, tn, tk_or_None)."""
    np_full = _round_up(N, 128)
    tm = _round_up(max(M, 1), sub) if M <= tm_base else tm_base

    def footprint(tm_, tn_, kb, k_tiled):
        # double-buffered x, w, bias blocks + double-buffered output block
        f = 2 * (tm_ * kb + kb * tn_ + tn_) * itemsize
        f += 2 * tm_ * tn_ * out_itemsize
        if k_tiled:
            f += tm_ * tn_ * 4  # f32 accumulator scratch
        return f

    if not force_k_split:
        # 1) whole-N, whole-K: W + bias fully resident, minimal weight DMA.
        if footprint(tm, np_full, K, False) <= budget:
            return tm, np_full, None
        # 2) tiled-N, whole-K.
        tn = min(tn_base, np_full)
        if footprint(tm, tn, K, False) <= budget:
            return tm, tn, None

    # 3) K-tiled path (large in_size or forced).
    tn = min(tn_base, np_full)
    tk = max(128, min(tk_pref, _round_up(K, 128)))
    while footprint(tm, tn, tk, True) > budget and tk > 128:
        tk //= 2
    while footprint(tm, tn, tk, True) > budget and tn > 128:
        tn //= 2
    while footprint(tm, tn, tk, True) > budget and tm > sub:
        tm = max(sub, _round_up(tm // 2, sub))
    return tm, tn, tk


# ---------------------------------------------------------------------------
# Wrapper: FC.forward for arbitrary leading dims
# ---------------------------------------------------------------------------
def fc(x, w, b, *, use_relu=True, dropout_r=0.0, force_k_split=False, tk=512):
    """FC.forward: x (..., K), w (K, N), b (N,) -> (..., N)."""
    del dropout_r  # TODO(synk): training-mode dropout not implemented (eval = identity)

    orig_shape = x.shape
    K = orig_shape[-1]
    K2, N = w.shape
    assert K == K2, f"in_size mismatch: {K} vs {K2}"

    M = 1
    for d in orig_shape[:-1]:
        M *= d

    # Compute in the input dtype (no forced f32 upcast); f32 accumulation.
    dtype = x.dtype
    out_dtype = dtype
    itemsize = jnp.dtype(dtype).itemsize
    out_itemsize = jnp.dtype(out_dtype).itemsize
    sub = max(8, 32 // itemsize)  # sublane alignment: 8 (f32), 16 (bf16)

    cap = _vmem_capacity_bytes()
    if cap >= 128 * 1024 * 1024:         # v5e / v6e
        budget = 80 * 1024 * 1024
        tm_base, tn_base = 512, 1024
        vmem_limit = 100 * 1024 * 1024
    else:                                 # v7x (64 MiB per TC)
        budget = 40 * 1024 * 1024
        tm_base, tn_base = 256, 512
        vmem_limit = 48 * 1024 * 1024

    tm, tn, tk_eff = _choose_tiles(M, K, N, itemsize, out_itemsize, budget,
                                   tm_base, tn_base, sub, force_k_split, tk)

    Mp = _round_up(max(M, 1), tm)
    Np = _round_up(N, tn) if tn != _round_up(N, 128) else _round_up(N, 128)
    Np = _round_up(Np, tn)
    Kp = K if tk_eff is None else _round_up(K, tk_eff)

    # --- operand preparation (pads / casts only when actually needed) -------
    xf = x.reshape(M, K)
    if xf.dtype != dtype:
        xf = xf.astype(dtype)
    if Mp != M or Kp != K:
        xf = jnp.pad(xf, ((0, Mp - M), (0, Kp - K)))

    wp = w if w.dtype == dtype else w.astype(dtype)
    if Kp != K or Np != N:
        wp = jnp.pad(wp, ((0, Kp - K), (0, Np - N)))

    bp = (b if b.dtype == dtype else b.astype(dtype)).reshape(1, N)
    if Np != N:
        bp = jnp.pad(bp, ((0, 0), (0, Np - N)))

    # --- grid / specs: N outer, M inner (weight block resident across M) ----
    if tk_eff is None:
        grid = (Np // tn, Mp // tm)
        in_specs = [
            pl.BlockSpec((tm, Kp), lambda j, i: (i, 0)),   # activations
            pl.BlockSpec((Kp, tn), lambda j, i: (0, j)),   # weights
            pl.BlockSpec((1, tn), lambda j, i: (0, j)),    # bias
        ]
        out_specs = pl.BlockSpec((tm, tn), lambda j, i: (i, j))
        scratch = []
        dim_sem = ("parallel", "parallel")
        kernel = functools.partial(_fc_kernel_whole_k, relu=use_relu)
    else:
        grid = (Np // tn, Mp // tm, Kp // tk_eff)
        in_specs = [
            pl.BlockSpec((tm, tk_eff), lambda j, i, k: (i, k)),
            pl.BlockSpec((tk_eff, tn), lambda j, i, k: (k, j)),
            pl.BlockSpec((1, tn), lambda j, i, k: (0, j)),
        ]
        out_specs = pl.BlockSpec((tm, tn), lambda j, i, k: (i, j))
        scratch = [pltpu.VMEM((tm, tn), jnp.float32)]
        dim_sem = ("parallel", "parallel", "arbitrary")
        kernel = functools.partial(_fc_kernel_k_tiled, relu=use_relu)

    out = pl.pallas_call(
        kernel,
        out_shape=jax.ShapeDtypeStruct((Mp, Np), out_dtype),
        grid_spec=pltpu.PrefetchScalarGridSpec(
            num_scalar_prefetch=0,
            grid=grid,
            in_specs=in_specs,
            out_specs=out_specs,
            scratch_shapes=scratch,
        ),
        compiler_params=pltpu.CompilerParams(
            dimension_semantics=dim_sem,
            vmem_limit_bytes=vmem_limit,
        ),
    )(xf, wp, bp)

    if Mp != M or Np != N:
        out = out[:M, :N]
    return out.reshape(orig_shape[:-1] + (N,))


# ---------------------------------------------------------------------------
# Smoke test
# ---------------------------------------------------------------------------
if __name__ == "__main__":
    key = jax.random.PRNGKey(0)
    kx, kw, kb = jax.random.split(key, 3)

    # --- test 1: bf16 fast path (FC(in=32, out=64) on (B=2, S=8) tokens) ----
    B, S, IN, OUT = 2, 8, 32, 64
    x = jax.random.normal(kx, (B, S, IN), dtype=jnp.float32).astype(jnp.bfloat16)
    w = (0.05 * jax.random.normal(kw, (IN, OUT), dtype=jnp.float32)).astype(jnp.bfloat16)
    b = (0.01 * jax.random.normal(kb, (OUT,), dtype=jnp.float32)).astype(jnp.bfloat16)

    fc_jit = jax.jit(functools.partial(fc, use_relu=True))
    y = fc_jit(x, w, b)
    jax.block_until_ready(y)

    ref = jnp.einsum("bsk,kn->bsn", x.astype(jnp.float32), w.astype(jnp.float32))
    ref = jnp.maximum(ref + b.astype(jnp.float32), 0.0)

    assert y.shape == (B, S, OUT)
    assert y.dtype == x.dtype
    yf = y.astype(jnp.float32)
    assert bool(jnp.all(jnp.isfinite(yf)))
    assert bool(jnp.allclose(yf, ref, atol=2e-2, rtol=2e-2))

    # --- test 2: f32 + forced K-tiled (accumulator) path ---------------------
    k2x, k2w, k2b = jax.random.split(jax.random.PRNGKey(1), 3)
    IN2, OUT2 = 256, 128
    x2 = jax.random.normal(k2x, (B, S, IN2), dtype=jnp.float32)
    w2 = 0.05 * jax.random.normal(k2w, (IN2, OUT2), dtype=jnp.float32)
    b2 = 0.01 * jax.random.normal(k2b, (OUT2,), dtype=jnp.float32)

    fc_kt = jax.jit(functools.partial(fc, use_relu=True, force_k_split=True, tk=128))
    y2 = fc_kt(x2, w2, b2)
    jax.block_until_ready(y2)

    ref2 = jnp.maximum(jnp.einsum("bsk,kn->bsn", x2, w2) + b2, 0.0)
    assert y2.shape == (B, S, OUT2)
    assert bool(jnp.all(jnp.isfinite(y2)))
    assert bool(jnp.allclose(y2, ref2, atol=2e-2, rtol=2e-2))

    print("KERNEL_OK")
</pallas_src>

<mosaic_0001>
module attributes {stable_mosaic.version = 11 : i64} {
  func.func @_fc_kernel_whole_k(%arg0: i32, %arg1: i32, %arg2: memref<16x32xbf16, #tpu.memory_space<vmem>>, %arg3: memref<32x128xbf16, #tpu.memory_space<vmem>>, %arg4: memref<1x128xbf16, #tpu.memory_space<vmem>>, %arg5: memref<16x128xbf16, #tpu.memory_space<vmem>>) attributes {dimension_semantics = [#tpu.dimension_semantics<parallel>, #tpu.dimension_semantics<parallel>], iteration_bounds = array<i64: 1, 1>, scalar_prefetch = 0 : i64, scratch_operands = 0 : i64, tpu.core_type = #tpu.core_type<tc>, window_params = [{transform_indices = @transform_0, window_bounds = array<i64: 16, 32>}, {transform_indices = @transform_1, window_bounds = array<i64: 32, 128>}, {transform_indices = @transform_2, window_bounds = array<i64: 1, 128>}, {transform_indices = @transform_3, window_bounds = array<i64: 16, 128>}]} {
    %c0 = arith.constant 0 : index
    %c0_0 = arith.constant 0 : index
    %0 = vector.load %arg2[%c0, %c0_0] : memref<16x32xbf16, #tpu.memory_space<vmem>>, vector<16x32xbf16>
    %c0_1 = arith.constant 0 : index
    %c0_2 = arith.constant 0 : index
    %1 = vector.load %arg3[%c0_1, %c0_2] : memref<32x128xbf16, #tpu.memory_space<vmem>>, vector<32x128xbf16>
    %cst = arith.constant dense<0.000000e+00> : vector<16x128xf32>
    %2 = tpu.matmul %0, %1, %cst {dimension_numbers = #tpu.dot_dimension_numbers<[1], [0], [0], [1], [0, 0, 1, 1], [], []>} : vector<16x32xbf16>, vector<32x128xbf16>, vector<16x128xf32> -> vector<16x128xf32>
    %c0_3 = arith.constant 0 : index
    %c0_4 = arith.constant 0 : index
    %3 = vector.load %arg4[%c0_3, %c0_4] : memref<1x128xbf16, #tpu.memory_space<vmem>>, vector<1x128xbf16>
    %4 = arith.extf %3 : vector<1x128xbf16> to vector<1x128xf32>
    %5 = vector.broadcast %4 : vector<1x128xf32> to vector<16x128xf32>
    %6 = arith.addf %2, %5 : vector<16x128xf32>
    %cst_5 = arith.constant 0.000000e+00 : f32
    %7 = vector.broadcast %cst_5 : f32 to vector<16x128xf32>
    %8 = arith.maximumf %6, %7 : vector<16x128xf32>
    %9 = arith.truncf %8 : vector<16x128xf32> to vector<16x128xbf16>
    %c0_6 = arith.constant 0 : index
    %c0_7 = arith.constant 0 : index
    %10 = vector.load %arg5[%c0_6, %c0_7] : memref<16x128xbf16, #tpu.memory_space<vmem>>, vector<16x128xbf16>
    tpu.vector_store %arg5[%c0_6, %c0_7], %9 {strides = array<i32>} : memref<16x128xbf16, #tpu.memory_space<vmem>>, vector<16x128xbf16>,
    return
  }
  func.func @transform_0(%arg0: i32, %arg1: i32) -> (i32, i32) {
    %c0_i32 = arith.constant 0 : i32
    %c0_i32_0 = arith.constant 0 : i32
    return %arg1, %c0_i32 : i32, i32
  }
  func.func @transform_1(%arg0: i32, %arg1: i32) -> (i32, i32) {
    %c0_i32 = arith.constant 0 : i32
    %c0_i32_0 = arith.constant 0 : i32
    return %c0_i32, %arg0 : i32, i32
  }
  func.func @transform_2(%arg0: i32, %arg1: i32) -> (i32, i32) {
    %c0_i32 = arith.constant 0 : i32
    %c0_i32_0 = arith.constant 0 : i32
    return %c0_i32, %arg0 : i32, i32
  }
  func.func @transform_3(%arg0: i32, %arg1: i32) -> (i32, i32) {
    %c0_i32 = arith.constant 0 : i32
    return %arg1, %arg0 : i32, i32
  }
}

</mosaic_0001>

<bundles_post_ra>
// kernel: fc.1
= control target key start
LH: loop header
LB: loop body
LE: loop exit
PB: predicated region body
PF: predicated region fallthrough
CT: control target
= control target key end

     0   :  { %v134_v0 = vmov 0.0   ;;  %vm135_vm0 = vmmov 0   ;;  %vm44_vm1 = vcmask 261120   ;;  %v23_v4 = vlaneseq  ;;  %s171_s1 = inlined_call_operand.vmem [shape: bf16[32,128], index: 1, kind: input, shape index: {}]   ;;  %s172_s0 = inlined_call_operand.vmem [shape: bf16[16,32], index: 0, kind: input, shape index: {}]   ;;  %s173_s2 = inlined_call_operand.vmem [shape: bf16[1,128], index: 2, kind: input, shape index: {}]   ;;  %s174_s3 = inlined_call_operand.vmem [shape: bf16[16,128], index: 3, kind: output, shape index: {}]  }
   0x1   :  { %121 = vmatprep.subr.bf16.mxu0 %v134_v0  ;;  %v131_v1 = vld [vmem:[%s171_s1] sm:$0xff]   ;;  %125 = vmatprep.mubr.msk.bf16.mxu0 %vm135_vm0, %v134_v0  ;;  %v132_v2 = vld [vmem:[%s171_s1 + $0x8] sm:$0xff]  }
   0x2   :  { %122 = vmatpush3.bf16.msra.mxu0 %v131_v1  ;;  %v133_v3 = vld [vmem:[%s172_s0] sm:$0xff]   ;;  %v24_v5 = vshrl.u32 %v23_v4, 7 }
   0x3   :  { %123 = vmatprep.subr.bf16.mxu0 %v134_v0  ;;  %v21_v6 = vld [vmem:[%s173_s2] sm:$0x1] }
   0x4   :  { %v22_v7 = vunpack.c.l.bf16 %v21_v6  ;;  %v25_v8 = vsub.s32 0, %v24_v5 }
   0x6   :  { %124 = vmatpush3.bf16.msra.mxu0 %v132_v2  ;;  %v26_v9 = vrot.slane %v22_v7, %v25_v8 }
   0x9   :  { %126 = vmatmul.mubr.msk.bf16.vlgmr.msra.gmra.mrb[0].mxu0 %vm44_vm1, %v133_v3 }
  0xdc   :  { %v82_v10 = vpop.f32.mrb[0].mxu0 }
  0xdd   :  { %v83_v11 = vadd.f32 %v82_v10, %v26_v9  ;;  %v127_v12 = vpop.f32.mrb[1].mxu0 }
  0xde   :  { %v85_v13 = vpop.f32.mrb[2].mxu0 }
  0xdf   :  { %v86_v14 = vadd.f32 %v85_v13, %v26_v9  ;;  %v128_v15 = vpop.f32.mrb[3].mxu0  ;;  %v89_v16 = vmax.f32 %v83_v11, 0.0 }
  0xe1   :  { %v90_v17 = vmax.f32 %v86_v14, 0.0 }
  0xe3   :  { %v116_v18 = vpack.c.bf16 %v90_v17, %v89_v16 }
  0xe5   :  { %117 = vst [vmem:[%s174_s3] sm:$0xff] %v116_v18  }

</bundles_post_ra>
